<compile_context>
chip_gen: v7x
topology: tpu7x:2x2x1
jax: 0.10.0
libtpu: 0.0.40
codegen_flags: <defaults>
</compile_context>

<pallas_src>
import math

import jax
import jax.numpy as jnp
from jax.experimental import pallas as pl
from jax.experimental.pallas import tpu as pltpu

_VMEM_LIMIT_BYTES = 48 * 1024 * 1024   # < v7x 64 MiB physical; raises v5e/v6e scoped defaults
_BN_EPS = 1e-5


# ----------------------------------------------------------------------------
# Pallas kernels
# ----------------------------------------------------------------------------

def _conv_bias_stats_kernel(p_ref, w_ref, b_ref, act_ref, sum_ref, sq_ref):
    """Pass 1: conv3x3 as one im2col MXU matmul per M-tile, + bias, + BN stat accum.

    p_ref  : (K, TM)    bf16 im2col patches, pixels on the 128-lane axis
    w_ref  : (Cout, K)  bf16 flattened conv weights (grid-resident)
    b_ref  : (Cout, 1)  f32  conv bias              (grid-resident)
    act_ref: (Cout, TM) f32  pre-BN activation tile (lane-dense)
    sum_ref: (Cout, 1)  f32  per-channel sum        (accumulator over the M grid)
    sq_ref : (Cout, 1)  f32  per-channel sum-of-sq  (accumulator over the M grid)
    """
    @pl.when(pl.program_id(0) == 0)
    def _():
        sum_ref[...] = jnp.zeros_like(sum_ref)
        sq_ref[...] = jnp.zeros_like(sq_ref)

    acc = jnp.dot(w_ref[...], p_ref[...], preferred_element_type=jnp.float32)
    acc = acc + b_ref[...]                                     # conv bias
    act_ref[...] = acc

    # single elementwise pass: accumulate sum and sum-of-squares (E[x^2]-mean^2 later)
    sum_ref[...] += jnp.sum(acc, axis=1, keepdims=True)
    sq_ref[...] += jnp.sum(acc * acc, axis=1, keepdims=True)


def _bn_relu_kernel(act_ref, scale_ref, shift_ref, o_ref):
    """Pass 2: y = act * scale + shift (folded BN affine), then ReLU. Lane-dense."""
    y = act_ref[...] * scale_ref[...] + shift_ref[...]
    o_ref[...] = jnp.maximum(y, 0.0).astype(o_ref.dtype)


# ----------------------------------------------------------------------------
# ConvBatchNorm layer wrapper (channel-major in / channel-major out)
# ----------------------------------------------------------------------------

def _pick_tile_m(m, max_tile=512):
    # TODO(synk): mask/pad the ragged tail once spatial sizes make M % 128 != 0.
    assert m % 128 == 0, f"M={m} must be a multiple of 128"
    tm = min(max_tile, m)
    while m % tm:
        tm -= 128
    return tm


def conv_bn_relu_cm(x_cm, w, conv_b, gamma, beta, *, max_tile_m=512):
    """One ConvBatchNorm layer: (Cin, N, H, W) -> (Cout, N, H, W), channel-major."""
    Cin, N, H, W = x_cm.shape
    Cout = w.shape[-1]
    M = N * H * W
    K = 9 * Cin
    TM = _pick_tile_m(M, max_tile_m)
    grid = (M // TM,)

    # Channel-major im2col (XLA-side layout ops only, no big transposes).
    # TODO(synk): replace with in-kernel halo tiling at production sizes so the 9x
    #             patch tensor never round-trips HBM.
    xp = jnp.pad(x_cm, ((0, 0), (0, 0), (1, 1), (1, 1))).astype(jnp.bfloat16)
    taps = [xp[:, :, dy:dy + H, dx:dx + W].reshape(Cin, M)
            for dy in range(3) for dx in range(3)]
    patches = jnp.concatenate(taps, axis=0)                    # (K, M), k = (dy, dx, ci)
    w_cm = w.reshape(K, Cout).T.astype(jnp.bfloat16)           # (Cout, K), same k order
    bias = conv_b.reshape(Cout, 1).astype(jnp.float32)

    # Pass 1: conv + bias per tile, accumulate per-channel BN statistics.
    act, ch_sum, ch_sq = pl.pallas_call(
        _conv_bias_stats_kernel,
        grid=grid,
        in_specs=[pl.BlockSpec((K, TM), lambda m: (0, m)),
                  pl.BlockSpec((Cout, K), lambda m: (0, 0)),
                  pl.BlockSpec((Cout, 1), lambda m: (0, 0))],
        out_specs=(pl.BlockSpec((Cout, TM), lambda m: (0, m)),
                   pl.BlockSpec((Cout, 1), lambda m: (0, 0)),
                   pl.BlockSpec((Cout, 1), lambda m: (0, 0))),
        out_shape=(jax.ShapeDtypeStruct((Cout, M), jnp.float32),
                   jax.ShapeDtypeStruct((Cout, 1), jnp.float32),
                   jax.ShapeDtypeStruct((Cout, 1), jnp.float32)),
        compiler_params=pltpu.CompilerParams(
            dimension_semantics=("arbitrary",),        # stats accumulate over M
            vmem_limit_bytes=_VMEM_LIMIT_BYTES),
    )(patches, w_cm, bias)

    # Fold BatchNorm batch statistics (biased var, eps=1e-5) into per-channel affine.
    inv_m = 1.0 / M
    mean = ch_sum * inv_m                                      # (Cout, 1)
    var = jnp.maximum(ch_sq * inv_m - mean * mean, 0.0)
    scale = gamma.reshape(Cout, 1) * jax.lax.rsqrt(var + _BN_EPS)
    shift = beta.reshape(Cout, 1) - mean * scale

    # Pass 2: normalize + ReLU, parallel over M (sharded across v7x's 2 TensorCores).
    # TODO(synk): optionally fuse this pass with the next layer's conv pass-1 (halo
    #             recompute) to save one HBM round trip of the activation per layer.
    y = pl.pallas_call(
        _bn_relu_kernel,
        grid=grid,
        in_specs=[pl.BlockSpec((Cout, TM), lambda m: (0, m)),
                  pl.BlockSpec((Cout, 1), lambda m: (0, 0)),
                  pl.BlockSpec((Cout, 1), lambda m: (0, 0))],
        out_specs=pl.BlockSpec((Cout, TM), lambda m: (0, m)),
        out_shape=jax.ShapeDtypeStruct((Cout, M), jnp.float32),
        compiler_params=pltpu.CompilerParams(
            dimension_semantics=("parallel",),
            vmem_limit_bytes=_VMEM_LIMIT_BYTES),
    )(act, scale, shift)

    return y.reshape(Cout, N, H, W)


# ----------------------------------------------------------------------------
# UpblockAttention forward (NCHW in / NCHW out); activations stay channel-major
# ----------------------------------------------------------------------------

def upsample2x_nearest_cm(x_cm):
    # nn.Upsample(scale_factor=2) default mode='nearest', channel-major layout
    return jnp.repeat(jnp.repeat(x_cm, 2, axis=2), 2, axis=3)


def attention_block(up, skip):
    # TODO(synk): Attention_block definition is not provided in the spec; identity.
    return up


def pix_level_module(skip):
    # TODO(synk): PixLevelModule definition is not provided in the spec; identity.
    return skip


def upblock_attention(x_nchw, skip_nchw, layer_params):
    """UpblockAttention.forward (NCHW in / NCHW out)."""
    # Single channel-major relayout at the boundary; no per-layer transposes.
    x = jnp.transpose(x_nchw, (1, 0, 2, 3))        # (C, N, H, W)
    skip = jnp.transpose(skip_nchw, (1, 0, 2, 3))

    up = upsample2x_nearest_cm(x)
    up = attention_block(up, skip)
    skip_att = pix_level_module(skip)
    y = jnp.concatenate([skip_att, up], axis=0)    # torch.cat([skip_x_att, up], dim=1)

    for (w, b, g, be) in layer_params:             # nConvs
        y = conv_bn_relu_cm(y, w, b, g, be)

    return jnp.transpose(y, (1, 0, 2, 3))          # back to NCHW


# ----------------------------------------------------------------------------
# Deterministic parameter init (mimics nn.Conv2d / nn.BatchNorm2d defaults)
# ----------------------------------------------------------------------------

def init_convbn_params(key, cin, cout):
    k_w, k_b = jax.random.split(key)
    fan_in = cin * 3 * 3
    bound = 1.0 / math.sqrt(fan_in)
    w = jax.random.uniform(k_w, (3, 3, cin, cout), jnp.float32, -bound, bound)
    b = jax.random.uniform(k_b, (cout,), jnp.float32, -bound, bound)
    gamma = jnp.ones((cout,), jnp.float32)
    beta = jnp.zeros((cout,), jnp.float32)
    return w, b, gamma, beta


# ----------------------------------------------------------------------------
# Pure-JAX f32 reference for verification
# ----------------------------------------------------------------------------

def reference_upblock(x_nchw, skip_nchw, layer_params):
    x = jnp.transpose(x_nchw, (0, 2, 3, 1))
    skip = jnp.transpose(skip_nchw, (0, 2, 3, 1))
    up = jnp.repeat(jnp.repeat(x, 2, axis=1), 2, axis=2)
    y = jnp.concatenate([skip, up], axis=-1)       # identity att / pixModule stubs
    for (w, b, g, be) in layer_params:
        y = jax.lax.conv_general_dilated(
            y, w, window_strides=(1, 1), padding="SAME",
            dimension_numbers=("NHWC", "HWIO", "NHWC"),
            precision=jax.lax.Precision.HIGHEST)
        y = y + b
        mean = jnp.mean(y, axis=(0, 1, 2), keepdims=True)
        var = jnp.mean((y - mean) ** 2, axis=(0, 1, 2), keepdims=True)
        y = (y - mean) * jax.lax.rsqrt(var + _BN_EPS) * g + be
        y = jnp.maximum(y, 0.0)
    return jnp.transpose(y, (0, 3, 1, 2))


# ----------------------------------------------------------------------------
# Main
# ----------------------------------------------------------------------------

if __name__ == "__main__":
    in_channels, out_channels, nb_Conv = 8, 8, 2
    N, H, W = 2, 16, 16   # decoder feature x; skip_x is (N, in_channels//2, 2H, 2W)

    key = jax.random.PRNGKey(0)
    k_x, k_s, k_p = jax.random.split(key, 3)

    # PyTorch-convention NCHW inputs.
    x_nchw = jax.random.normal(k_x, (N, in_channels // 2, H, W), jnp.float32)
    skip_nchw = jax.random.normal(k_s, (N, in_channels // 2, 2 * H, 2 * W), jnp.float32)

    layer_params = []
    cin = in_channels
    for _ in range(nb_Conv):
        k_p, k_layer = jax.random.split(k_p)
        layer_params.append(init_convbn_params(k_layer, cin, out_channels))
        cin = out_channels

    run = jax.jit(upblock_attention)
    ref_fn = jax.jit(reference_upblock)

    out = jax.block_until_ready(run(x_nchw, skip_nchw, layer_params))
    ref = jax.block_until_ready(ref_fn(x_nchw, skip_nchw, layer_params))

    assert out.shape == (N, out_channels, 2 * H, 2 * W), out.shape
    # bf16 MXU operands (f32 accumulation) vs the Precision.HIGHEST f32 reference.
    max_err = float(jnp.max(jnp.abs(out - ref)))
    assert jnp.allclose(out, ref, rtol=2e-2, atol=2e-2), f"mismatch, max abs err {max_err:.3e}"

    print("KERNEL_OK")
</pallas_src>

<mosaic_0001>
module attributes {stable_mosaic.version = 11 : i64} {
  func.func @_bn_relu_kernel(%arg0: i32, %arg1: memref<8x512xf32, #tpu.memory_space<vmem>>, %arg2: memref<8x1xf32, #tpu.memory_space<vmem>>, %arg3: memref<8x1xf32, #tpu.memory_space<vmem>>, %arg4: memref<8x512xf32, #tpu.memory_space<vmem>>) attributes {dimension_semantics = [#tpu.dimension_semantics<parallel>], iteration_bounds = array<i64: 4>, scalar_prefetch = 0 : i64, scratch_operands = 0 : i64, tpu.core_type = #tpu.core_type<tc>, window_params = [{transform_indices = @transform_0, window_bounds = array<i64: 8, 512>}, {pipeline_mode = #tpu.pipeline_mode<synchronous>, transform_indices = @transform_1, window_bounds = array<i64: 8, 1>}, {pipeline_mode = #tpu.pipeline_mode<synchronous>, transform_indices = @transform_2, window_bounds = array<i64: 8, 1>}, {transform_indices = @transform_3, window_bounds = array<i64: 8, 512>}]} {
    %c0 = arith.constant 0 : index
    %c0_0 = arith.constant 0 : index
    %0 = vector.load %arg1[%c0, %c0_0] : memref<8x512xf32, #tpu.memory_space<vmem>>, vector<8x512xf32>
    %c0_1 = arith.constant 0 : index
    %c0_2 = arith.constant 0 : index
    %1 = vector.load %arg2[%c0_1, %c0_2] : memref<8x1xf32, #tpu.memory_space<vmem>>, vector<8x1xf32>
    %2 = vector.broadcast %1 : vector<8x1xf32> to vector<8x512xf32>
    %3 = arith.mulf %0, %2 : vector<8x512xf32>
    %c0_3 = arith.constant 0 : index
    %c0_4 = arith.constant 0 : index
    %4 = vector.load %arg3[%c0_3, %c0_4] : memref<8x1xf32, #tpu.memory_space<vmem>>, vector<8x1xf32>
    %5 = vector.broadcast %4 : vector<8x1xf32> to vector<8x512xf32>
    %6 = arith.addf %3, %5 : vector<8x512xf32>
    %cst = arith.constant 0.000000e+00 : f32
    %7 = vector.broadcast %cst : f32 to vector<8x512xf32>
    %8 = arith.maximumf %6, %7 : vector<8x512xf32>
    %c0_5 = arith.constant 0 : index
    %c0_6 = arith.constant 0 : index
    %9 = vector.load %arg4[%c0_5, %c0_6] : memref<8x512xf32, #tpu.memory_space<vmem>>, vector<8x512xf32>
    tpu.vector_store %arg4[%c0_5, %c0_6], %8 {strides = array<i32>} : memref<8x512xf32, #tpu.memory_space<vmem>>, vector<8x512xf32>,
    return
  }
  func.func @transform_0(%arg0: i32) -> (i32, i32) {
    %c0_i32 = arith.constant 0 : i32
    %c0_i32_0 = arith.constant 0 : i32
    return %c0_i32, %arg0 : i32, i32
  }
  func.func @transform_1(%arg0: i32) -> (i32, i32) {
    %c0_i32 = arith.constant 0 : i32
    %c0_i32_0 = arith.constant 0 : i32
    %c0_i32_1 = arith.constant 0 : i32
    return %c0_i32, %c0_i32_0 : i32, i32
  }
  func.func @transform_2(%arg0: i32) -> (i32, i32) {
    %c0_i32 = arith.constant 0 : i32
    %c0_i32_0 = arith.constant 0 : i32
    %c0_i32_1 = arith.constant 0 : i32
    return %c0_i32, %c0_i32_0 : i32, i32
  }
  func.func @transform_3(%arg0: i32) -> (i32, i32) {
    %c0_i32 = arith.constant 0 : i32
    %c0_i32_0 = arith.constant 0 : i32
    return %c0_i32, %arg0 : i32, i32
  }
}

module attributes {stable_mosaic.version = 11 : i64} {
  func.func @_conv_bias_stats_kernel(%arg0: i32, %arg1: memref<72x512xbf16, #tpu.memory_space<vmem>>, %arg2: memref<8x72xbf16, #tpu.memory_space<vmem>>, %arg3: memref<8x1xf32, #tpu.memory_space<vmem>>, %arg4: memref<8x512xf32, #tpu.memory_space<vmem>>, %arg5: memref<8x1xf32, #tpu.memory_space<vmem>>, %arg6: memref<8x1xf32, #tpu.memory_space<vmem>>) attributes {dimension_semantics = [#tpu.dimension_semantics<arbitrary>], iteration_bounds = array<i64: 4>, scalar_prefetch = 0 : i64, scratch_operands = 0 : i64, tpu.core_type = #tpu.core_type<tc>, window_params = [{transform_indices = @transform_0, window_bounds = array<i64: 72, 512>}, {pipeline_mode = #tpu.pipeline_mode<synchronous>, transform_indices = @transform_1, window_bounds = array<i64: 8, 72>}, {pipeline_mode = #tpu.pipeline_mode<synchronous>, transform_indices = @transform_2, window_bounds = array<i64: 8, 1>}, {transform_indices = @transform_3, window_bounds = array<i64: 8, 512>}, {pipeline_mode = #tpu.pipeline_mode<synchronous>, transform_indices = @transform_4, window_bounds = array<i64: 8, 1>}, {pipeline_mode = #tpu.pipeline_mode<synchronous>, transform_indices = @transform_5, window_bounds = array<i64: 8, 1>}]} {
    %c0_i32 = arith.constant 0 : i32
    %0 = arith.cmpi eq, %arg0, %c0_i32 : i32
    %1 = arith.extui %0 : i1 to i32
    %c0_i32_0 = arith.constant 0 : i32
    %2 = arith.cmpi ne, %1, %c0_i32_0 : i32
    scf.if %2 {
      %cst_18 = arith.constant 0.000000e+00 : f32
      %21 = vector.broadcast %cst_18 : f32 to vector<8x1xf32>
      %c0_19 = arith.constant 0 : index
      %c0_20 = arith.constant 0 : index
      %22 = vector.load %arg5[%c0_19, %c0_20] : memref<8x1xf32, #tpu.memory_space<vmem>>, vector<8x1xf32>
      tpu.vector_store %arg5[%c0_19, %c0_20], %21 {strides = array<i32>} : memref<8x1xf32, #tpu.memory_space<vmem>>, vector<8x1xf32>,
      %cst_21 = arith.constant 0.000000e+00 : f32
      %23 = vector.broadcast %cst_21 : f32 to vector<8x1xf32>
      %c0_22 = arith.constant 0 : index
      %c0_23 = arith.constant 0 : index
      %24 = vector.load %arg6[%c0_22, %c0_23] : memref<8x1xf32, #tpu.memory_space<vmem>>, vector<8x1xf32>
      tpu.vector_store %arg6[%c0_22, %c0_23], %23 {strides = array<i32>} : memref<8x1xf32, #tpu.memory_space<vmem>>, vector<8x1xf32>,
    } else {
    }
    %c0 = arith.constant 0 : index
    %c0_1 = arith.constant 0 : index
    %3 = vector.load %arg2[%c0, %c0_1] : memref<8x72xbf16, #tpu.memory_space<vmem>>, vector<8x72xbf16>
    %c0_2 = arith.constant 0 : index
    %c0_3 = arith.constant 0 : index
    %4 = vector.load %arg1[%c0_2, %c0_3] : memref<72x512xbf16, #tpu.memory_space<vmem>>, vector<72x512xbf16>
    %cst = arith.constant dense<0.000000e+00> : vector<8x512xf32>
    %5 = tpu.matmul %3, %4, %cst {dimension_numbers = #tpu.dot_dimension_numbers<[1], [0], [0], [1], [0, 0, 1, 1], [], []>} : vector<8x72xbf16>, vector<72x512xbf16>, vector<8x512xf32> -> vector<8x512xf32>
    %c0_4 = arith.constant 0 : index
    %c0_5 = arith.constant 0 : index
    %6 = vector.load %arg3[%c0_4, %c0_5] : memref<8x1xf32, #tpu.memory_space<vmem>>, vector<8x1xf32>
    %7 = vector.broadcast %6 : vector<8x1xf32> to vector<8x512xf32>
    %8 = arith.addf %5, %7 : vector<8x512xf32>
    %c0_6 = arith.constant 0 : index
    %c0_7 = arith.constant 0 : index
    %9 = vector.load %arg4[%c0_6, %c0_7] : memref<8x512xf32, #tpu.memory_space<vmem>>, vector<8x512xf32>
    tpu.vector_store %arg4[%c0_6, %c0_7], %8 {strides = array<i32>} : memref<8x512xf32, #tpu.memory_space<vmem>>, vector<8x512xf32>,
    %c0_8 = arith.constant 0 : index
    %c0_9 = arith.constant 0 : index
    %10 = vector.load %arg5[%c0_8, %c0_9] : memref<8x1xf32, #tpu.memory_space<vmem>>, vector<8x1xf32>
    %cst_10 = arith.constant dense<0.000000e+00> : vector<8xf32>
    %11 = vector.multi_reduction <add>, %8, %cst_10 [1] : vector<8x512xf32> to vector<8xf32>
    %12 = vector.shape_cast %11 : vector<8xf32> to vector<8x1xf32>
    %13 = arith.addf %10, %12 : vector<8x1xf32>
    %c0_11 = arith.constant 0 : index
    %c0_12 = arith.constant 0 : index
    %14 = vector.load %arg5[%c0_11, %c0_12] : memref<8x1xf32, #tpu.memory_space<vmem>>, vector<8x1xf32>
    tpu.vector_store %arg5[%c0_11, %c0_12], %13 {strides = array<i32>} : memref<8x1xf32, #tpu.memory_space<vmem>>, vector<8x1xf32>,
    %c0_13 = arith.constant 0 : index
    %c0_14 = arith.constant 0 : index
    %15 = vector.load %arg6[%c0_13, %c0_14] : memref<8x1xf32, #tpu.memory_space<vmem>>, vector<8x1xf32>
    %16 = arith.mulf %8, %8 : vector<8x512xf32>
    %cst_15 = arith.constant dense<0.000000e+00> : vector<8xf32>
    %17 = vector.multi_reduction <add>, %16, %cst_15 [1] : vector<8x512xf32> to vector<8xf32>
    %18 = vector.shape_cast %17 : vector<8xf32> to vector<8x1xf32>
    %19 = arith.addf %15, %18 : vector<8x1xf32>
    %c0_16 = arith.constant 0 : index
    %c0_17 = arith.constant 0 : index
    %20 = vector.load %arg6[%c0_16, %c0_17] : memref<8x1xf32, #tpu.memory_space<vmem>>, vector<8x1xf32>
    tpu.vector_store %arg6[%c0_16, %c0_17], %19 {strides = array<i32>} : memref<8x1xf32, #tpu.memory_space<vmem>>, vector<8x1xf32>,
    return
  }
  func.func @transform_0(%arg0: i32) -> (i32, i32) {
    %c0_i32 = arith.constant 0 : i32
    %c0_i32_0 = arith.constant 0 : i32
    return %c0_i32, %arg0 : i32, i32
  }
  func.func @transform_1(%arg0: i32) -> (i32, i32) {
    %c0_i32 = arith.constant 0 : i32
    %c0_i32_0 = arith.constant 0 : i32
    %c0_i32_1 = arith.constant 0 : i32
    return %c0_i32, %c0_i32_0 : i32, i32
  }
  func.func @transform_2(%arg0: i32) -> (i32, i32) {
    %c0_i32 = arith.constant 0 : i32
    %c0_i32_0 = arith.constant 0 : i32
    %c0_i32_1 = arith.constant 0 : i32
    return %c0_i32, %c0_i32_0 : i32, i32
  }
  func.func @transform_3(%arg0: i32) -> (i32, i32) {
    %c0_i32 = arith.constant 0 : i32
    %c0_i32_0 = arith.constant 0 : i32
    return %c0_i32, %arg0 : i32, i32
  }
  func.func @transform_4(%arg0: i32) -> (i32, i32) {
    %c0_i32 = arith.constant 0 : i32
    %c0_i32_0 = arith.constant 0 : i32
    %c0_i32_1 = arith.constant 0 : i32
    return %c0_i32, %c0_i32_0 : i32, i32
  }
  func.func @transform_5(%arg0: i32) -> (i32, i32) {
    %c0_i32 = arith.constant 0 : i32
    %c0_i32_0 = arith.constant 0 : i32
    %c0_i32_1 = arith.constant 0 : i32
    return %c0_i32, %c0_i32_0 : i32, i32
  }
}

</mosaic_0001>

<bundles_post_ra>
// kernel: upblock_attention.5
= control target key start
LH: loop header
LB: loop body
LE: loop exit
PB: predicated region body
PF: predicated region fallthrough
CT: control target
= control target key end

     0   :  { %s312_s12 = smov 0   ;;  %s335_s0 = inlined_call_operand.vmem [shape: f32[8,2048], index: 0, kind: input, shape index: {}]   ;;  %s336_s1 = inlined_call_operand.vmem [shape: f32[8,1], index: 1, kind: input, shape index: {}]   ;;  %s337_s2 = inlined_call_operand.vmem [shape: f32[8,1], index: 2, kind: input, shape index: {}]   ;;  %s338_s3 = inlined_call_operand.vmem [shape: f32[8,2048], index: 3, kind: output, shape index: {}]  }
   0x1 LB: > { %s262_s13 = sadd.s32 4294967295, %s289_s12   ;;  %p266_p0 = scmp.ge.s32.totalorder %s289_s12, 1  ;;  %s289_s12 = sphi %s312_s12, %s13_s12  }
   0x2   : > { %p138_p1 = scmp.lt.s32.totalorder %s289_s12, 5 }
   0x4   : > { %p139_p2 = pnand %p266_p0, %p138_p1 }
   0x5   : > { %v178_v0 = vld [vmem:[%s336_s1] sm:$0xff] (!%p139_p2)  ;;  %v291_v1 = vmov (!%p139_p2), 0   ;;  %s267_s18 = sshll.u32 (!%p139_p2), %s262_s13, 2 }
   0x6   : > { %142 = sbr.rel (%p139_p2) target bundleno = 145 (0x91), region = 32  ;;  %282 = vset.pattern.permute.xlu0 (!%p139_p2), %v291_v1  ;;  %v188_v2 = vld [vmem:[%s337_s2] sm:$0xff] (!%p139_p2)  ;;  %p163_p3 = scmp.lt.s32.totalorder (!%p139_p2), %s267_s18, 15 }
   0x7   : > { %181 = vperm.xlu0 (!%p139_p2), %282, %v178_v0  }
   0xb   : > { %191 = vperm.xlu0 (!%p139_p2), %282, %v188_v2  }
   0xd   : > { %s340_s18 = smov (!%p163_p3, %s267_s18), 15 }
   0xe   : > { %s268_s19 = sshll.u32 %s340_s18, 3 }
   0xf   : > { %s166_s22 = scalar_lea.vmem %s335_s0, %s268_s19  ;;  %s172_s25 = scalar_lea.vmem %s338_s3, %s268_s19 }
  0x10   : > { %v174_v3 = vld [vmem:[%s166_s22] sm:$0xff]  ;;  %v175_v5 = vld [vmem:[%s166_s22 + $0x8] sm:$0xff]  ;;  %v176_v6 = vld [vmem:[%s166_s22 + $0x10] sm:$0xff] }
  0x11   : > { %v177_v7 = vld [vmem:[%s166_s22 + $0x18] sm:$0xff] }
  0x86   : > { %v182_v4 = vpop.permute.xlu0 %181 }
  0x87   : > { %v184_v8 = vmul.f32 %v182_v4, %v174_v3  ;;  %v185_v9 = vmul.f32 %v182_v4, %v175_v5  ;;  %v186_v10 = vmul.f32 %v182_v4, %v176_v6  ;;  %v187_v11 = vmul.f32 %v182_v4, %v177_v7 }
  0x8a   : > { %v192_v12 = vpop.permute.xlu0 %191 }
  0x8b   : > { %v194_v13 = vadd.f32 %v192_v12, %v184_v8  ;;  %v195_v14 = vadd.f32 %v192_v12, %v185_v9  ;;  %v196_v15 = vadd.f32 %v192_v12, %v186_v10  ;;  %v197_v16 = vadd.f32 %v192_v12, %v187_v11 }
  0x8d   : > { %v198_v17 = vmax.f32 %v194_v13, 0.0  ;;  %v199_v18 = vmax.f32 %v195_v14, 0.0  ;;  %v200_v19 = vmax.f32 %v196_v15, 0.0  ;;  %v201_v20 = vmax.f32 %v197_v16, 0.0 }
  0x8f   : > { %202 = vst [vmem:[%s172_s25] sm:$0xff] %v198_v17  ;;  %203 = vst [vmem:[%s172_s25 + $0x8] sm:$0xff] %v199_v18 }
  0x90   : > { %204 = vst [vmem:[%s172_s25 + $0x10] sm:$0xff] %v200_v19  ;;  %205 = vst [vmem:[%s172_s25 + $0x18] sm:$0xff] %v201_v20 }
  0x91 PF: > { %s13_s12 = sadd.s32 1, %s289_s12  }
  0x92   : > { %p10_p4 = scmp.ge.s32.totalorder %s13_s12, 6  }
  0x94   :  { %12 = sbr.rel (!%p10_p4) target bundleno = 1 (0x1), region = 62 }

// kernel: upblock_attention.4
= control target key start
LH: loop header
LB: loop body
LE: loop exit
PB: predicated region body
PF: predicated region fallthrough
CT: control target
= control target key end

     0   :  { %s747_s18 = smov 0   ;;  %s749_s19 = smov 0   ;;  %s871_s0 = inlined_call_operand.vmem [shape: bf16[72,2048], index: 0, kind: input, shape index: {}]   ;;  %s872_s1 = inlined_call_operand.vmem [shape: bf16[8,72], index: 1, kind: input, shape index: {}]   ;;  %s873_s2 = inlined_call_operand.vmem [shape: f32[8,1], index: 2, kind: input, shape index: {}]   ;;  %s874_s3 = inlined_call_operand.vmem [shape: f32[8,2048], index: 3, kind: output, shape index: {0}]   ;;  %s875_s4 = inlined_call_operand.vmem [shape: f32[8,1], index: 4, kind: output, shape index: {1}]   ;;  %s876_s5 = inlined_call_operand.vmem [shape: f32[8,1], index: 5, kind: output, shape index: {2}]  }
   0x1   :  { %s751_s20 = smov 0  }
   0x2 LB: > { %s597_s21 = sadd.s32 4294967295, %s713_s20   ;;  %s764_s22 = sadd.s32 1, %s713_s20   ;;  %s713_s20 = sphi %s751_s20, %s879_s20   ;;  %s709_s19 = sphi %s749_s19, %s878_s19   ;;  %s705_s18 = sphi %s747_s18, %s877_s18  }
   0x3   : > { %s20_s23 = ssub.s32 %s713_s20, %s764_s22  ;;  %s23_s24 = sadd.s32 1, %s709_s19 }
   0x4   : > { %p21_p0 = scmp.eq.s32.totalorder %s20_s23, 0  ;;  %p30_p1 = scmp.ne.s32.totalorder %s709_s19, %s705_s18 }
   0x5   : > { %p31_p2 = scmp.eq.s32.totalorder %s713_s20, 0  ;;  %p600_p4 = scmp.ge.s32.totalorder %s713_s20, 4 }
   0x6   : > { %s773_s25 = scalar_select %p21_p0, %s709_s19, %s23_s24  }
   0x7   : > { %p32_p3 = por %p31_p2, %p30_p1  ;;  %172 = sbr.rel (%p600_p4) target bundleno = 27 (0x1b), region = 24 }
   0xe   : > { %175 = sbr.rel (!%p32_p3) target bundleno = 27 (0x1b), region = 28  ;;  %s177_s26 = sand.u32 (%p32_p3), 1, %s709_s19  }
   0xf   : > { %s633_s27 = sshll.u32 (%p32_p3), %s713_s20, 4  ;;  %s634_s28 = smul.u32 (%p32_p3), 144, %s177_s26 }
  0x10   : > { %s781_s6 = scalar_lea.vmem (%p32_p3), %s871_s0, %s633_s27 }
  0x11   : > { %v195_v0 = vld [vmem:[%s781_s6] sm:$0xff] (%p32_p3)  ;;  %v197_v1 = vld [vmem:[%s781_s6 + $0x8] sm:$0xff] (%p32_p3)  ;;  %s179_s7 = scalar_lea.vmem (%p32_p3), [#allocation2], %s634_s28 }
  0x12   : > { %v199_v2 = vld [vmem:[%s781_s6 + $0x40] sm:$0xff] (%p32_p3)  ;;  %v201_v3 = vld [vmem:[%s781_s6 + $0x48] sm:$0xff] (%p32_p3)  ;;  %196 = vst [vmem:[%s179_s7] sm:$0xff] (%p32_p3), %v195_v0  ;;  %198 = vst [vmem:[%s179_s7 + $0x8] sm:$0xff] (%p32_p3), %v197_v1 }
  0x13   : > { %v203_v4 = vld [vmem:[%s781_s6 + $0x80] sm:$0xff] (%p32_p3)  ;;  %v205_v5 = vld [vmem:[%s781_s6 + $0x88] sm:$0xff] (%p32_p3)  ;;  %200 = vst [vmem:[%s179_s7 + $0x10] sm:$0xff] (%p32_p3), %v199_v2  ;;  %202 = vst [vmem:[%s179_s7 + $0x18] sm:$0xff] (%p32_p3), %v201_v3 }
  0x14   : > { %204 = vst [vmem:[%s179_s7 + $0x20] sm:$0xff] (%p32_p3), %v203_v4  ;;  %206 = vst [vmem:[%s179_s7 + $0x28] sm:$0xff] (%p32_p3), %v205_v5  ;;  %v207_v6 = vld [vmem:[%s781_s6 + $0xc0] sm:$0xff] (%p32_p3)  ;;  %v209_v7 = vld [vmem:[%s781_s6 + $0xc8] sm:$0xff] (%p32_p3) }
  0x15   : > { %v211_v8 = vld [vmem:[%s781_s6 + $0x100] sm:$0xff]  ;;  %208 = vst [vmem:[%s179_s7 + $0x30] sm:$0xff] %v207_v6  ;;  %210 = vst [vmem:[%s179_s7 + $0x38] sm:$0xff] %v209_v7  ;;  %v213_v9 = vld [vmem:[%s781_s6 + $0x108] sm:$0xff] }
  0x16   : > { %212 = vst [vmem:[%s179_s7 + $0x40] sm:$0xff] %v211_v8  ;;  %v215_v10 = vld [vmem:[%s781_s6 + $0x140] sm:$0xff]  ;;  %v217_v11 = vld [vmem:[%s781_s6 + $0x148] sm:$0xff]  ;;  %214 = vst [vmem:[%s179_s7 + $0x48] sm:$0xff] %v213_v9 }
  0x17   : > { %216 = vst [vmem:[%s179_s7 + $0x50] sm:$0xff] %v215_v10  ;;  %218 = vst [vmem:[%s179_s7 + $0x58] sm:$0xff] %v217_v11  ;;  %v219_v12 = vld [vmem:[%s781_s6 + $0x180] sm:$0xff]  ;;  %v221_v13 = vld [vmem:[%s781_s6 + $0x188] sm:$0xff] }
  0x18   : > { %v223_v14 = vld [vmem:[%s781_s6 + $0x1c0] sm:$0xff]  ;;  %220 = vst [vmem:[%s179_s7 + $0x60] sm:$0xff] %v219_v12  ;;  %222 = vst [vmem:[%s179_s7 + $0x68] sm:$0xff] %v221_v13  ;;  %v225_v15 = vld [vmem:[%s781_s6 + $0x1c8] sm:$0xff] }
  0x19   : > { %224 = vst [vmem:[%s179_s7 + $0x70] sm:$0xff] %v223_v14  ;;  %v227_v16 = vld [vmem:[%s781_s6 + $0x200] sm:$0xff]  ;;  %v229_v17 = vld [vmem:[%s781_s6 + $0x208] sm:$0xff]  ;;  %226 = vst [vmem:[%s179_s7 + $0x78] sm:$0xff] %v225_v15 }
  0x1a   : > { %228 = vst [vmem:[%s179_s7 + $0x80] sm:$0xff] %v227_v16  ;;  %230 = vst [vmem:[%s179_s7 + $0x88] sm:$0xff] %v229_v17 }
  0x1b PF: > { %p603_p5 = scmp.ge.s32.totalorder %s713_s20, 1  ;;  %p235_p6 = scmp.lt.s32.totalorder %s713_s20, 5 }
  0x1d   : > { %p236_p7 = pnand %p603_p5, %p235_p6 }
  0x1e   : > { %s242_s8 = sand.u32 (!%p236_p7), 1, %s705_s18   ;;  %s604_s9 = sshll.u32 (!%p236_p7), %s597_s21, 2 }
  0x1f   : > { %239 = sbr.rel (%p236_p7) target bundleno = 435 (0x1b3), region = 51  ;;  %p271_p8 = scmp.lt.s32.totalorder (!%p236_p7), %s604_s9, 15 }
  0x20   : > { %s635_s10 = smul.u32 (!%p236_p7), 144, %s242_s8  ;;  %p606_p9 = scmp.ne.s32.totalorder (!%p236_p7), %s597_s21, 0 }
  0x22   : > { %s811_s15 = scalar_lea.vmem (!%p236_p7), [#allocation2], %s635_s10 }
  0x26   : > { %s881_s9 = smov (!%p271_p8, %s604_s9), 15  ;;  %280 = sbr.rel (%p606_p9) target bundleno = 45 (0x2d), region = 59 }
  0x27   : > { %s605_s11 = sshll.u32 %s881_s9, 3  ;;  %vm281_vm0 = vcmask (!%p606_p9), 7168   ;;  %v715_v18 = vmov (!%p606_p9), 0.0  }
  0x28   : > { %s809_s14 = scalar_lea.vmem %s874_s3, %s605_s11  ;;  %282 = vst.msk [vmem:[%s875_s4] sm:$0xff] (!%p606_p9), %vm281_vm0, %v715_v18  ;;  %283 = vst.msk [vmem:[%s876_s5] sm:$0xff] (!%p606_p9), %vm281_vm0, %v715_v18 }
  0x2d PF: > { %v663_v19 = vld [vmem:[%s811_s15 + $0x4] ss:$16 sps:$4 sm:$0xff]   ;;  %v665_v20 = vld [vmem:[%s811_s15 + $0xc] ss:$16 sps:$4 sm:$0xff]   ;;  %v716_v21 = vmov 0   ;;  %vm403_vm1 = vcmask 1043456  }
  0x2e   : > { %448 = vmatprep.mubr.bf16.mxu0 %v716_v21  ;;  %489 = vmatprep.mubr.bf16.mxu1 %v716_v21  ;;  %v667_v22 = vld [vmem:[%s811_s15] ss:$16 sps:$4 sm:$0xff]   ;;  %v668_v23 = vld [vmem:[%s811_s15 + $0x8] ss:$16 sps:$4 sm:$0xff]   ;;  %v669_v24 = vld [vmem:[%s811_s15 + $0x24] ss:$16 sps:$4 sm:$0xff]  }
  0x2f   : > { %416 = vmatprep.subr.bf16.mxu0 %v663_v19  ;;  %662 = vset.pattern.permute.xlu0 %v716_v21  ;;  %v671_v25 = vld [vmem:[%s811_s15 + $0x2c] ss:$16 sps:$4 sm:$0xff]   ;;  %v673_v26 = vld [vmem:[%s811_s15 + $0x20] ss:$16 sps:$4 sm:$0xff]   ;;  %v674_v27 = vld [vmem:[%s811_s15 + $0x28] ss:$16 sps:$4 sm:$0xff]  }
  0x30   : > { %457 = vmatprep.subr.bf16.mxu1 %v665_v20  ;;  %417 = vmatpush1.bf16.msra.mxu0 %v667_v22  ;;  %v675_v28 = vld [vmem:[%s811_s15 + $0x44] ss:$16 sps:$4 sm:$0xff]   ;;  %v677_v29 = vld [vmem:[%s811_s15 + $0x4c] ss:$16 sps:$4 sm:$0xff]   ;;  %v679_v30 = vld [vmem:[%s811_s15 + $0x40] ss:$16 sps:$4 sm:$0xff]  }
  0x31   : > { %458 = vmatpush1.bf16.msra.mxu1 %v668_v23  ;;  %418 = vmatprep.subr.bf16.mxu0 %v669_v24  ;;  %v680_v31 = vld [vmem:[%s811_s15 + $0x48] ss:$16 sps:$4 sm:$0xff]   ;;  %v681_v32 = vld [vmem:[%s811_s15 + $0x64] ss:$16 sps:$4 sm:$0xff]   ;;  %v683_v33 = vld [vmem:[%s811_s15 + $0x6c] ss:$16 sps:$4 sm:$0xff]  }
  0x32   : > { %459 = vmatprep.subr.bf16.mxu1 %v671_v25  ;;  %v301_v34 = vld [vmem:[%s811_s15 + $0x80] sm:$0xff]  ;;  %v302_v35 = vld [vmem:[%s811_s15 + $0x88] sm:$0xff]  ;;  %vm399_vm2 = vcmask 588800   ;;  %vm509_vm3 = vcmask 7168  }
  0x33   : > { %v303_v36 = vld [vmem:[%s873_s2] sm:$0xff]  ;;  %v686_v38 = vld [vmem:[%s811_s15 + $0x68] ss:$16 sps:$4 sm:$0xff]   ;;  %v624_v39 = vcombine.high %v301_v34, %v301_v34  ;;  %v626_v40 = vcombine.high %v302_v35, %v302_v35  ;;  %v623_v41 = vcombine.low %v301_v34, %v301_v34  ;;  %v625_v42 = vcombine.low %v302_v35, %v302_v35 }
  0x34   : > { %419 = vmatpush1.bf16.msra.mxu0 %v673_v26  ;;  %v685_v37 = vld [vmem:[%s811_s15 + $0x60] ss:$16 sps:$4 sm:$0xff]   ;;  %306 = vperm.xlu0 %662, %v303_v36  }
  0x35   : > { %460 = vmatpush1.bf16.msra.mxu1 %v674_v27  ;;  %420 = vmatprep.subr.bf16.mxu0 %v675_v28  ;;  %v405_v43 = vsel %vm403_vm1, %v623_v41, 0  ;;  %v411_v44 = vsel %vm403_vm1, %v625_v42, 0  ;;  %v284_v45 = vld [vmem:[%s872_s1] sm:$0xf] }
  0x36   : > { %461 = vmatprep.subr.bf16.mxu1 %v677_v29  ;;  %v502_v5 = vld [vmem:[%s875_s4] sm:$0xff] }
  0x37   : > { %v511_v7 = vld [vmem:[%s876_s5] sm:$0xff] }
  0x38   : > { %421 = vmatpush1.bf16.msra.mxu0 %v679_v30 }
  0x39   : > { %462 = vmatpush1.bf16.msra.mxu1 %v680_v31  ;;  %422 = vmatprep.subr.bf16.mxu0 %v681_v32 }
  0x3a   : > { %463 = vmatprep.subr.bf16.mxu1 %v683_v33 }
  0x3c   : > { %423 = vmatpush1.bf16.msra.mxu0 %v685_v37 }
  0x3d   : > { %464 = vmatpush1.bf16.msra.mxu1 %v686_v38  ;;  %627 = vmatprep.subr.msk.bf16.mxu0 %vm403_vm1, %v624_v39 }
  0x3e   : > { %629 = vmatprep.subr.msk.bf16.mxu1 %vm403_vm1, %v626_v40 }
  0x40   : > { %425 = vmatpush1.bf16.msra.mxu0 %v405_v43 }
  0x41   : > { %466 = vmatpush1.bf16.msra.mxu1 %v411_v44 }
  0x43   : > { %628 = vmatmul.mubr.msk.bf16.vlgmr.msra.gmra.mrb[0].mxu0 %vm399_vm2, %v284_v45 }
  0x44   : > { %630 = vmatmul.mubr.msk.bf16.vlgmr.msra.gmra.mrb[0].mxu1 %vm399_vm2, %v284_v45 }
  0xb3   : > { %v307_v46 = vpop.permute.xlu0 %306 }
 0x116   : > { %v450_v47 = vpop.f32.mrb[0].mxu0 }
 0x117   : > { %v491_v48 = vpop.f32.mrb[0].mxu1  ;;  %v451_v49 = vadd.f32 %v450_v47, %v307_v46  ;;  %v452_v51 = vpop.f32.mrb[1].mxu0 }
 0x118   : > { %v492_v50 = vadd.f32 %v491_v48, %v307_v46  ;;  %v493_v52 = vpop.f32.mrb[1].mxu1  ;;  %v453_v53 = vadd.f32 %v452_v51, %v307_v46  ;;  %v454_v55 = vpop.f32.mrb[2].mxu0 }
 0x119   : > { %v494_v54 = vadd.f32 %v493_v52, %v307_v46  ;;  %v495_v56 = vpop.f32.mrb[2].mxu1  ;;  %498 = vst [vmem:[%s809_s14] sm:$0xff] %v451_v49  ;;  %v512_v57 = vmul.f32 %v451_v49, %v451_v49  ;;  %v455_v58 = vpop.f32.mrb[3].mxu0 }
 0x11a   : > { %500 = vst [vmem:[%s809_s14 + $0x10] sm:$0xff] %v492_v50  ;;  %v496_v59 = vpop.f32.mrb[3].mxu1  ;;  %499 = vst [vmem:[%s809_s14 + $0x8] sm:$0xff] %v453_v53  ;;  %v503_v60 = vadd.f32 %v453_v53, %v451_v49  ;;  %v513_v61 = vmul.f32 %v453_v53, %v453_v53  ;;  %v514_v63 = vmul.f32 %v492_v50, %v492_v50 }
 0x11b   : > { %501 = vst [vmem:[%s809_s14 + $0x18] sm:$0xff] %v494_v54  ;;  %v515_v2 = vmul.f32 %v494_v54, %v494_v54 }
 0x11c   : > { %v504_v62 = vadd.f32 %v503_v60, %v492_v50  ;;  %v516_v0 = vadd.f32 %v513_v61, %v512_v57 }
 0x11e   : > { %v505_v1 = vadd.f32 %v504_v62, %v494_v54  ;;  %v517_v3 = vadd.f32 %v516_v0, %v514_v63 }
 0x120   : > { %506 = vadd.xlane.f32.xlu0 %v505_v1  ;;  %v518_v4 = vadd.f32 %v517_v3, %v515_v2 }
 0x122   : > { %519 = vadd.xlane.f32.xlu1 %v518_v4 }
 0x1ad   : > { %v507_v6 = vpop.xlane.xlu0 %506 }
 0x1ae   : > { %v508_v8 = vadd.f32 %v507_v6, %v502_v5 }
 0x1af   : > { %v520_v9 = vpop.xlane.xlu1 %519 }
 0x1b0   : > { %510 = vst.msk [vmem:[%s875_s4] sm:$0xff] %vm509_vm3, %v508_v8  ;;  %v521_v10 = vadd.f32 %v520_v9, %v511_v7 }
 0x1b2   : > { %522 = vst.msk [vmem:[%s876_s5] sm:$0xff] %vm509_vm3, %v521_v10 }
 0x1b3 PF: > { %p13_p10 = scmp.ge.s32.totalorder %s764_s22, 6   ;;  %s877_s18 = smov %s709_s19 }
 0x1b4   : > { %s878_s19 = smov %s773_s25  ;;  %s879_s20 = smov %s764_s22 }
 0x1b5   :  { %15 = sbr.rel (!%p13_p10) target bundleno = 2 (0x2), region = 110 }

</bundles_post_ra>
